<compile_context>
chip_gen: v7x
topology: tpu7x:2x2x1
jax: 0.10.0
libtpu: 0.0.40
codegen_flags: <defaults>
</compile_context>

<pallas_src>
import functools

import jax
import jax.numpy as jnp
from jax.experimental import pallas as pl
from jax.experimental.pallas import tpu as pltpu


# ----------------------------------------------------------------------------
# Deterministic parameter construction: torchaudio.functional.melscale_fbanks
# with mel_scale='htk' (default) and norm='slaney'.  Pure glue, plain JAX f32.
# ----------------------------------------------------------------------------
def melscale_fbanks(n_freqs, f_min, f_max, n_mels, sample_rate):
    all_freqs = jnp.linspace(0.0, sample_rate // 2, n_freqs, dtype=jnp.float32)

    def hz_to_mel(f):
        return 2595.0 * jnp.log10(1.0 + f / 700.0)

    def mel_to_hz(m):
        return 700.0 * (10.0 ** (m / 2595.0) - 1.0)

    m_min = hz_to_mel(jnp.asarray(f_min, jnp.float32))
    m_max = hz_to_mel(jnp.asarray(f_max, jnp.float32))
    m_pts = jnp.linspace(m_min, m_max, n_mels + 2)
    f_pts = mel_to_hz(m_pts)

    f_diff = f_pts[1:] - f_pts[:-1]                       # (n_mels + 1,)
    slopes = f_pts[None, :] - all_freqs[:, None]          # (n_freqs, n_mels + 2)
    down = -slopes[:, :-2] / f_diff[:-1]
    up = slopes[:, 2:] / f_diff[1:]
    fb = jnp.maximum(0.0, jnp.minimum(down, up))          # (n_freqs, n_mels)

    # slaney norm
    enorm = 2.0 / (f_pts[2:n_mels + 2] - f_pts[:n_mels])
    fb = fb * enorm[None, :]
    return fb.astype(jnp.float32)


# ----------------------------------------------------------------------------
# Pallas kernel: per-row-tile squared error -> small matmul with fbanks
# -> clamp/log -> (masked) partial sum (one scalar per grid step, in SMEM).
# ----------------------------------------------------------------------------
def mel_loss_kernel(est_ref, ref_ref, fb_ref, out_ref, *,
                    total_rows, tile_r, need_mask):
    i = pl.program_id(0)

    diff = est_ref[...] - ref_ref[...]                    # [tile_r, n_stft] f32 (VPU)
    sq = diff * diff                                      # |.|^2 for real inputs
    mel = jnp.dot(sq, fb_ref[...],
                  preferred_element_type=jnp.float32)     # [tile_r, n_mels] (MXU)
    logmel = jnp.log(jnp.maximum(mel, 1e-6))              # EUP

    if need_mask:
        # Mask rows beyond the true row count (ragged last tile reads padding).
        row_ids = jax.lax.broadcasted_iota(jnp.int32, logmel.shape, 0) + i * tile_r
        logmel = jnp.where(row_ids < total_rows, logmel, 0.0)

    out_ref[0, 0] = jnp.sum(logmel)


def mel_loss(estimated_spec, reference_spec, fbanks, *, tile_r=4096):
    """estimated_spec, reference_spec: [..., T, n_stft] real-valued."""
    n_stft, n_mels = fbanks.shape
    assert estimated_spec.shape == reference_spec.shape
    assert estimated_spec.shape[-1] == n_stft

    # Flatten leading dims + time into rows (glue reshape outside the kernel).
    est2 = estimated_spec.reshape(-1, n_stft).astype(jnp.float32)
    ref2 = reference_spec.reshape(-1, n_stft).astype(jnp.float32)
    fbanks = fbanks.astype(jnp.float32)
    total_rows = est2.shape[0]

    # Row tile: multiple of 8 sublanes, no larger than needed for small inputs.
    tile_r = max(8, min(tile_r, ((total_rows + 7) // 8) * 8))
    num_tiles = pl.cdiv(total_rows, tile_r)
    need_mask = (total_rows % tile_r) != 0

    kernel = functools.partial(
        mel_loss_kernel, total_rows=total_rows, tile_r=tile_r,
        need_mask=need_mask)

    partials = pl.pallas_call(
        kernel,
        out_shape=jax.ShapeDtypeStruct((num_tiles, 1), jnp.float32),
        grid=(num_tiles,),
        in_specs=[
            pl.BlockSpec((tile_r, n_stft), lambda i: (i, 0)),
            pl.BlockSpec((tile_r, n_stft), lambda i: (i, 0)),
            # fbanks: constant block index -> resident in VMEM, DMA'd once.
            pl.BlockSpec((n_stft, n_mels), lambda i: (0, 0)),
        ],
        out_specs=pl.BlockSpec((1, 1), lambda i: (i, 0),
                               memory_space=pltpu.MemorySpace.SMEM),
        compiler_params=pltpu.CompilerParams(
            dimension_semantics=("parallel",),
            vmem_limit_bytes=32 * 1024 * 1024),
    )(est2, ref2, fbanks)

    # Finalize: single f32 divide in the wrapper (exact full mean).
    return jnp.sum(partials) / jnp.float32(total_rows * n_mels)


def _reference(est, ref, fbanks):
    mel = jnp.matmul((est - ref) ** 2, fbanks)
    return jnp.mean(jnp.mean(jnp.log(jnp.clip(mel, 1e-6)), axis=-2))


if __name__ == "__main__":
    sample_rate = 16000
    n_stft = 101
    n_mels = 10

    fbanks = melscale_fbanks(n_stft, 0.0, sample_rate / 2.0, n_mels, sample_rate)

    key = jax.random.PRNGKey(0)

    # Small shapes consistent with the module's forward: [B, T, n_stft].
    B, T = 2, 8
    k1, k2, k3, k4 = jax.random.split(key, 4)
    est = jax.random.uniform(k1, (B, T, n_stft), jnp.float32)
    ref = jax.random.uniform(k2, (B, T, n_stft), jnp.float32)

    loss = mel_loss(est, ref, fbanks)
    jax.block_until_ready(loss)
    expected = _reference(est, ref, fbanks)
    assert jnp.allclose(loss, expected, rtol=1e-5, atol=1e-5), (loss, expected)

    # Exercise the multi-tile path with a ragged last tile (masking check).
    B2, T2 = 3, 50   # R = 150 rows, tile_r = 64 -> 3 tiles, last tile partial
    est2 = jax.random.uniform(k3, (B2, T2, n_stft), jnp.float32)
    ref2 = jax.random.uniform(k4, (B2, T2, n_stft), jnp.float32)
    loss2 = mel_loss(est2, ref2, fbanks, tile_r=64)
    jax.block_until_ready(loss2)
    expected2 = _reference(est2, ref2, fbanks)
    assert jnp.allclose(loss2, expected2, rtol=1e-5, atol=1e-5), (loss2, expected2)

    print("KERNEL_OK")
</pallas_src>

<mosaic_0001>
module attributes {stable_mosaic.version = 11 : i64} {
  func.func @mel_loss_kernel(%arg0: i32, %arg1: memref<16x101xf32, #tpu.memory_space<vmem>>, %arg2: memref<16x101xf32, #tpu.memory_space<vmem>>, %arg3: memref<101x10xf32, #tpu.memory_space<vmem>>, %arg4: memref<1x1xf32, #tpu.memory_space<smem>>) attributes {dimension_semantics = [#tpu.dimension_semantics<parallel>], iteration_bounds = array<i64: 1>, scalar_prefetch = 0 : i64, scratch_operands = 0 : i64, tpu.core_type = #tpu.core_type<tc>, window_params = [{transform_indices = @transform_0, window_bounds = array<i64: 16, 101>}, {transform_indices = @transform_1, window_bounds = array<i64: 16, 101>}, {pipeline_mode = #tpu.pipeline_mode<synchronous>, transform_indices = @transform_2, window_bounds = array<i64: 101, 10>}, {transform_indices = @transform_3, window_bounds = array<i64: 1, 1>}]} {
    %c0 = arith.constant 0 : index
    %c0_0 = arith.constant 0 : index
    %0 = vector.load %arg1[%c0, %c0_0] : memref<16x101xf32, #tpu.memory_space<vmem>>, vector<16x101xf32>
    %c0_1 = arith.constant 0 : index
    %c0_2 = arith.constant 0 : index
    %1 = vector.load %arg2[%c0_1, %c0_2] : memref<16x101xf32, #tpu.memory_space<vmem>>, vector<16x101xf32>
    %2 = arith.subf %0, %1 : vector<16x101xf32>
    %3 = arith.mulf %2, %2 : vector<16x101xf32>
    %c0_3 = arith.constant 0 : index
    %c0_4 = arith.constant 0 : index
    %4 = vector.load %arg3[%c0_3, %c0_4] : memref<101x10xf32, #tpu.memory_space<vmem>>, vector<101x10xf32>
    %cst = arith.constant dense<0.000000e+00> : vector<16x10xf32>
    %5 = tpu.matmul %3, %4, %cst {dimension_numbers = #tpu.dot_dimension_numbers<[1], [0], [0], [1], [0, 0, 1, 1], [], []>} : vector<16x101xf32>, vector<101x10xf32>, vector<16x10xf32> -> vector<16x10xf32>
    %cst_5 = arith.constant 9.99999997E-7 : f32
    %6 = vector.broadcast %cst_5 : f32 to vector<16x10xf32>
    %7 = arith.maximumf %5, %6 : vector<16x10xf32>
    %8 = math.log %7 : vector<16x10xf32>
    %9 = vector.shape_cast %8 : vector<16x10xf32> to vector<1x16x10xf32>
    %cst_6 = arith.constant dense<0.000000e+00> : vector<1xf32>
    %10 = vector.multi_reduction <add>, %9, %cst_6 [1, 2] : vector<1x16x10xf32> to vector<1xf32>
    %11 = vector.shape_cast %10 : vector<1xf32> to vector<1x1x1xf32>
    %12 = vector.extract %11[0, 0, 0] : f32 from vector<1x1x1xf32>
    %c0_7 = arith.constant 0 : index
    %c0_8 = arith.constant 0 : index
    %13 = memref.load %arg4[%c0_7, %c0_8] : memref<1x1xf32, #tpu.memory_space<smem>>
    memref.store %12, %arg4[%c0_7, %c0_8] : memref<1x1xf32, #tpu.memory_space<smem>>
    return
  }
  func.func @transform_0(%arg0: i32) -> (i32, i32) {
    %c0_i32 = arith.constant 0 : i32
    %c0_i32_0 = arith.constant 0 : i32
    return %arg0, %c0_i32 : i32, i32
  }
  func.func @transform_1(%arg0: i32) -> (i32, i32) {
    %c0_i32 = arith.constant 0 : i32
    %c0_i32_0 = arith.constant 0 : i32
    return %arg0, %c0_i32 : i32, i32
  }
  func.func @transform_2(%arg0: i32) -> (i32, i32) {
    %c0_i32 = arith.constant 0 : i32
    %c0_i32_0 = arith.constant 0 : i32
    %c0_i32_1 = arith.constant 0 : i32
    return %c0_i32, %c0_i32_0 : i32, i32
  }
  func.func @transform_3(%arg0: i32) -> (i32, i32) {
    %c0_i32 = arith.constant 0 : i32
    %c0_i32_0 = arith.constant 0 : i32
    return %arg0, %c0_i32 : i32, i32
  }
}

</mosaic_0001>

<bundles_post_ra>
// kernel: tpu_custom_call.1
= control target key start
LH: loop header
LB: loop body
LE: loop exit
PB: predicated region body
PF: predicated region fallthrough
CT: control target
= control target key end

     0   :  { %s332_s0 = inlined_call_operand.vmem [shape: f32[16,101], index: 0, kind: input, shape index: {}]   ;;  %s333_s1 = inlined_call_operand.vmem [shape: f32[16,101], index: 1, kind: input, shape index: {}]   ;;  %s334_s2 = inlined_call_operand.vmem [shape: f32[101,10], index: 2, kind: input, shape index: {}]   ;;  %s335_s3 = inlined_call_operand.hbm [shape: f32[1,1], index: 3, kind: output, shape index: {}]  }
   0x1   :  { %v23_v0 = vld [vmem:[%s334_s2] sm:$0xff]  ;;  %v24_v1 = vld [vmem:[%s334_s2 + $0x8] sm:$0xff]  ;;  %v25_v2 = vld [vmem:[%s334_s2 + $0x10] sm:$0xff] }
   0x2   :  { %v203_v3 = vpack.c.bf16 %v24_v1, %v23_v0  ;;  %v26_v4 = vld [vmem:[%s334_s2 + $0x18] sm:$0xff]  ;;  %v27_v6 = vld [vmem:[%s334_s2 + $0x20] sm:$0xff]  ;;  %v28_v7 = vld [vmem:[%s334_s2 + $0x28] sm:$0xff] }
   0x3   :  { %v207_v5 = vpack.c.bf16 %v26_v4, %v25_v2  ;;  %v15_v8 = vld [vmem:[%s332_s0] sm:$0xff]  ;;  %v211_v10 = vpack.c.bf16 %v28_v7, %v27_v6 }
   0x4   :  { %204 = vmatprep.subr.bf16.mxu0 %v203_v3  ;;  %v17_v9 = vld [vmem:[%s333_s1] sm:$0xff] }
   0x5   :  { %206 = vmatpush3.bf16.msra.mxu0 %v203_v3  ;;  %v19_v11 = vsub.f32 %v15_v8, %v17_v9 }
   0x6   :  { %208 = vmatprep.subr.bf16.mxu0 %v207_v5 }
   0x7   :  { %8 = vsyncpa [#allocation3], 0  ;;  %v29_v12 = vld [vmem:[%s334_s2 + $0x30] sm:$0xff]  ;;  %v30_v13 = vld [vmem:[%s334_s2 + $0x38] sm:$0xff]  ;;  %vm36_vm0 = vcmask 826368   ;;  %v21_v14 = vmul.f32 %v19_v11, %v19_v11  ;;  %vm43_vm1 = vcmask 1044480  }
   0x8   :  { %v215_v15 = vpack.c.bf16 %v30_v13, %v29_v12  ;;  %v31_v16 = vld [vmem:[%s334_s2 + $0x40] sm:$0xff]  ;;  %v32_v17 = vld [vmem:[%s334_s2 + $0x48] sm:$0xff]  ;;  %v33_v19 = vld [vmem:[%s334_s2 + $0x50] sm:$0xff]  ;;  %vm128_vm2 = vcmask 80896   ;;  %s234_s19 = scalar_lea.hbm %s335_s3, 16 }
   0x9   :  { %210 = vmatpush3.bf16.msra.mxu0 %v207_v5  ;;  %200 = vmatprep.mubr.msk.f32.mxu0 %vm36_vm0, %v21_v14  ;;  %v219_v18 = vpack.c.bf16 %v32_v17, %v31_v16  ;;  %v34_v20 = vld [vmem:[%s334_s2 + $0x58] sm:$0xff]  ;;  %v16_v22 = vld [vmem:[%s332_s0 + $0x8] sm:$0xff]  ;;  %v35_v25 = vld [vmem:[%s334_s2 + $0x60] sm:$0x1f]  ;;  %p235_p0 = scmp.ne.s32.totalorder %s335_s3, %s234_s19  ;;  %p238_p1 = scmp.lt.u32.totalorder %s234_s19, %s335_s3 }
   0xa   :  { %212 = vmatprep.subr.bf16.mxu0 %v211_v10  ;;  %v223_v21 = vpack.c.bf16 %v34_v20, %v33_v19  ;;  %v18_v23 = vld [vmem:[%s333_s1 + $0x8] sm:$0xff] }
   0xb   :  { %v20_v24 = vsub.f32 %v16_v22, %v18_v23  ;;  %p240_p2 = pnand %p238_p1, %p235_p0 }
   0xd   :  { %214 = vmatpush3.bf16.msra.mxu0 %v211_v10  ;;  %v22_v26 = vmul.f32 %v20_v24, %v20_v24 }
   0xe   :  { %216 = vmatprep.subr.bf16.mxu0 %v215_v15 }
  0x11   :  { %218 = vmatpush3.bf16.msra.mxu0 %v215_v15 }
  0x12   :  { %220 = vmatprep.subr.bf16.mxu0 %v219_v18 }
  0x15   :  { %222 = vmatpush3.bf16.msra.mxu0 %v219_v18 }
  0x16   :  { %224 = vmatprep.subr.bf16.mxu0 %v223_v21 }
  0x19   :  { %226 = vmatpush3.bf16.msra.mxu0 %v223_v21 }
  0x1a   :  { %198 = vmatprep.subr.msk.mxu0 %vm43_vm1, %v35_v25 }
  0x1d   :  { %199 = vmatpush3.msk.msra.mxu0 %vm43_vm1, %v35_v25 }
  0x1e   :  { %201 = vmatmul.mubr.msk.f32.vlgmr.msra.gmra.mrb[0].mxu0 %vm36_vm0, %v22_v26 }
  0xf1   :  { %v202_v27 = vpop.f32.mrb[0].mxu0 }
  0xf2   :  { %v123_v28 = vmax.f32 %v202_v27, 1e-06  ;;  %v113_v29 = vpop.f32.mrb[1].mxu0 }
  0xf3   :  { %v122_v30 = vmax.f32 %v113_v29, 1e-06 }
  0xf4   :  { %230 = vlog2.f32 %v123_v28 }
  0xf5   :  { %232 = vlog2.f32 %v122_v30 }
  0xfe   :  { %v231_v31 = vpop.eup %230 }
  0xff   :  { %v233_v32 = vpop.eup %232  ;;  %v127_v33 = vmul.f32 0.6931472, %v231_v31 }
 0x100   :  { %v125_v34 = vmul.f32 0.6931472, %v233_v32 }
 0x101   :  { %v130_v35 = vsel %vm128_vm2, %v127_v33, 0.0 }
 0x102   :  { %v129_v36 = vsel %vm128_vm2, %v125_v34, 0.0 }
 0x103   :  { %v131_v37 = vadd.f32 %v130_v35, %v129_v36 }
 0x105   :  { %132 = vadd.xlane.f32.xlu0 %v131_v37 }
 0x192   :  { %v133_v38 = vpop.xlane.xlu0 %132 }
 0x193   :  { %v134_v39 = vrot.slane %v133_v38, 4 }
 0x195   :  { %v135_v40 = vadd.f32 %v134_v39, %v133_v38 }
 0x197   :  { %v136_v41 = vrot.slane %v135_v40, 2 }
 0x199   :  { %v137_v42 = vadd.f32 %v136_v41, %v135_v40 }
 0x19b   :  { %v138_v43 = vrot.slane %v137_v42, 1 }
 0x19d   :  { %v139_v44 = vadd.f32 %v138_v43, %v137_v42 }
 0x19f   :  { %227 = vpush %v139_v44 }
 0x1d0   :  { %s228_s0 = spop %227 }
 0x1d1   :  { %142 = sst [smem:[#allocation2]] %s228_s0 }
 0x1d2   :  { %243 = shalt.err (!%p240_p2)
}
 0x1d3   :  { %s246_s24 = smov [#allocation2]  }
 0x1d4   :  { %150 = dma.smem_to_hbm %s246_s24, 16, %s335_s3, [#allocation3]  }
 0x1d5   :  { %244 = dma.done.wait [#allocation3], 16  }
 0x1d6   :  { %245 = vsyncadd [#allocation3], 4294967280 }
 0x1d7   :  { %154 = sfence }
 0x1d8   :  { %155 = vsyncpa [#allocation3], 1 }

</bundles_post_ra>
